<compile_context>
chip_gen: v7x
topology: tpu7x:2x2x1
jax: 0.10.0
libtpu: 0.0.40
codegen_flags: <defaults>
</compile_context>

<pallas_src>
import math
import functools

import jax
import jax.numpy as jnp
from jax import lax
from jax.experimental import pallas as pl
from jax.experimental.pallas import tpu as pltpu


def _mha_kernel(x_ref, mask_ref,
                wq_ref, bq_ref, wk_ref, bk_ref, wv_ref, bv_ref,
                o_ref, *, num_heads, head_dim):
    S = x_ref.shape[1]

    x = x_ref[0]                                   # (S, H) bf16

    # Full-width projections: one (S,H)@(H,H) bf16 MXU matmul each, f32 acc.
    q = jnp.dot(x, wq_ref[...], preferred_element_type=jnp.float32) + bq_ref[...]
    k = jnp.dot(x, wk_ref[...], preferred_element_type=jnp.float32) + bk_ref[...]
    v = jnp.dot(x, wv_ref[...], preferred_element_type=jnp.float32) + bv_ref[...]

    # Scale queries once in f32, then a single full-width cast back to bf16
    # so the attention matmuls also run on the bf16 MXU path.
    scale = 1.0 / math.sqrt(head_dim)
    q = (q * scale).astype(jnp.bfloat16)           # (S, H)
    k = k.astype(jnp.bfloat16)
    v = v.astype(jnp.bfloat16)

    # Hoist the additive-mask broadcast (1,S) -> (S,S) out of the head loop
    # (JAX does not CSE broadcast_in_dim).
    mask = jnp.broadcast_to(mask_ref[0, 0], (S, S))    # f32

    ctx_heads = []
    for h in range(num_heads):                     # static, NH is small
        lo = h * head_dim
        qh = q[:, lo:lo + head_dim]                # (S, Dh) bf16
        kh = k[:, lo:lo + head_dim]
        vh = v[:, lo:lo + head_dim]

        # q @ k^T without materializing a transpose: contract last axes.
        scores = lax.dot_general(
            qh, kh,
            dimension_numbers=(((1,), (1,)), ((), ())),
            preferred_element_type=jnp.float32)    # (S, S) f32
        scores = scores + mask

        # Numerically-stable softmax; reciprocal goes to the EUP slot.
        m = jnp.max(scores, axis=-1, keepdims=True)
        p = jnp.exp(scores - m)
        denom = jnp.sum(p, axis=-1, keepdims=True)
        p = p * pl.reciprocal(denom, approx=True)

        ctx_heads.append(
            jnp.dot(p.astype(jnp.bfloat16), vh,
                    preferred_element_type=jnp.float32))   # (S, Dh) f32

    # Single lane-dense (S, H) store instead of per-head masked partial stores.
    out = jnp.concatenate(ctx_heads, axis=-1)      # (S, H) f32
    o_ref[0] = out.astype(o_ref.dtype)


def multi_head_attention(x, attention_mask, params, *, num_heads):
    """x: [B, S, H] f32, attention_mask: [B, 1, 1, S] f32 (additive)."""
    B, S, H = x.shape
    assert H % num_heads == 0
    head_dim = H // num_heads
    wq, bq, wk, bk, wv, bv = params                # weights (H,H), biases (1,H)

    # bf16 activations / weights for the MXU (f32 accumulation in-kernel);
    # biases and mask stay f32.
    x_bf = x.astype(jnp.bfloat16)
    wq_bf = wq.astype(jnp.bfloat16)
    wk_bf = wk.astype(jnp.bfloat16)
    wv_bf = wv.astype(jnp.bfloat16)

    kernel = functools.partial(_mha_kernel, num_heads=num_heads,
                               head_dim=head_dim)

    # Advisory cost estimate for XLA's scheduler.
    flops = B * (6 * S * H * H + 4 * num_heads * S * S * head_dim)
    transcendentals = B * num_heads * S * S
    bytes_accessed = (B * S * H * 2 + 3 * H * H * 2 + 3 * H * 4
                      + B * S * 4 + B * S * H * 4)

    # Rough per-grid-step VMEM budget (double-buffered ins/outs + f32
    # temporaries) with 2x headroom, clamped well inside v7x's 64 MiB VMEM.
    est = (2 * S * H * 2            # x block (bf16, double-buffered)
           + 2 * 3 * H * H * 2      # weights (bf16)
           + 2 * 3 * H * 4          # biases
           + 2 * S * 4              # mask
           + 2 * S * H * 4          # output block (f32)
           + 3 * S * H * 4          # q, k, v
           + 4 * S * S * 4)         # score / prob temporaries
    vmem_limit = int(min(max(2 * est, 16 * 1024 * 1024), 48 * 1024 * 1024))

    return pl.pallas_call(
        kernel,
        out_shape=jax.ShapeDtypeStruct((B, S, H), x.dtype),
        grid_spec=pltpu.PrefetchScalarGridSpec(
            num_scalar_prefetch=0,
            grid=(B,),
            in_specs=[
                pl.BlockSpec((1, S, H), lambda b: (b, 0, 0)),        # x
                pl.BlockSpec((1, 1, 1, S), lambda b: (b, 0, 0, 0)),  # mask
                pl.BlockSpec((H, H), lambda b: (0, 0)),              # Wq
                pl.BlockSpec((1, H), lambda b: (0, 0)),              # bq
                pl.BlockSpec((H, H), lambda b: (0, 0)),              # Wk
                pl.BlockSpec((1, H), lambda b: (0, 0)),              # bk
                pl.BlockSpec((H, H), lambda b: (0, 0)),              # Wv
                pl.BlockSpec((1, H), lambda b: (0, 0)),              # bv
            ],
            out_specs=pl.BlockSpec((1, S, H), lambda b: (b, 0, 0)),
        ),
        compiler_params=pltpu.CompilerParams(
            dimension_semantics=("parallel",),
            vmem_limit_bytes=vmem_limit),
        cost_estimate=pl.CostEstimate(
            flops=flops,
            transcendentals=transcendentals,
            bytes_accessed=bytes_accessed),
    )(x_bf, attention_mask, wq_bf, bq, wk_bf, bk, wv_bf, bv)


def reference_mha(x, attention_mask, params, *, num_heads):
    """Pure-JAX f32 reference mirroring HF BertSelfAttention."""
    B, S, H = x.shape
    Dh = H // num_heads
    wq, bq, wk, bk, wv, bv = params
    q = x @ wq + bq
    k = x @ wk + bk
    v = x @ wv + bv

    def split(t):  # (B, S, H) -> (B, NH, S, Dh)
        return t.reshape(B, S, num_heads, Dh).transpose(0, 2, 1, 3)

    q, k, v = split(q), split(k), split(v)
    scores = jnp.einsum("bhqd,bhkd->bhqk", q, k) / math.sqrt(Dh)
    scores = scores + attention_mask               # (B,1,1,S) broadcasts
    probs = jax.nn.softmax(scores, axis=-1)
    ctx = jnp.einsum("bhqk,bhkd->bhqd", probs, v)
    return ctx.transpose(0, 2, 1, 3).reshape(B, S, H)


if __name__ == "__main__":
    # Small, BERT-consistent shapes: batch=2, seq=8, hidden=32, heads=2.
    B, S, H, NH = 2, 8, 32, 2

    key = jax.random.PRNGKey(0)
    k_x, k_wq, k_bq, k_wk, k_bk, k_wv, k_bv, k_m = jax.random.split(key, 8)

    x = jax.random.normal(k_x, (B, S, H), dtype=jnp.float32)

    # Deterministic parameter init (Linear-equivalent: y = x @ W + b).
    scale = 1.0 / math.sqrt(H)
    wq = jax.random.normal(k_wq, (H, H), dtype=jnp.float32) * scale
    bq = jax.random.normal(k_bq, (1, H), dtype=jnp.float32) * 0.01
    wk = jax.random.normal(k_wk, (H, H), dtype=jnp.float32) * scale
    bk = jax.random.normal(k_bk, (1, H), dtype=jnp.float32) * 0.01
    wv = jax.random.normal(k_wv, (H, H), dtype=jnp.float32) * scale
    bv = jax.random.normal(k_bv, (1, H), dtype=jnp.float32) * 0.01
    params = (wq, bq, wk, bk, wv, bv)

    # HF-style additive extended attention mask: 0 where attended, -1e4 padded.
    pad = (jax.random.uniform(k_m, (B, S)) > 0.8).astype(jnp.float32)
    attention_mask = (pad * -10000.0).reshape(B, 1, 1, S)

    out = multi_head_attention(x, attention_mask, params, num_heads=NH)
    out = jax.block_until_ready(out)

    ref = reference_mha(x, attention_mask, params, num_heads=NH)
    assert out.shape == (B, S, H)
    max_err = float(jnp.max(jnp.abs(out - ref)))
    # bf16 MXU inputs -> loosened tolerance vs the f32 reference.
    assert jnp.allclose(out, ref, atol=5e-2, rtol=5e-2), \
        f"mismatch vs reference (max abs err {max_err:.4e})"

    print("KERNEL_OK")
</pallas_src>

<mosaic_0001>
module attributes {stable_mosaic.version = 11 : i64} {
  func.func @_mha_kernel(%arg0: i32, %arg1: memref<1x8x32xbf16, #tpu.memory_space<vmem>>, %arg2: memref<1x1x1x8xf32, #tpu.memory_space<vmem>>, %arg3: memref<32x32xbf16, #tpu.memory_space<vmem>>, %arg4: memref<1x32xf32, #tpu.memory_space<vmem>>, %arg5: memref<32x32xbf16, #tpu.memory_space<vmem>>, %arg6: memref<1x32xf32, #tpu.memory_space<vmem>>, %arg7: memref<32x32xbf16, #tpu.memory_space<vmem>>, %arg8: memref<1x32xf32, #tpu.memory_space<vmem>>, %arg9: memref<1x8x32xf32, #tpu.memory_space<vmem>>) attributes {dimension_semantics = [#tpu.dimension_semantics<parallel>], iteration_bounds = array<i64: 2>, scalar_prefetch = 0 : i64, scratch_operands = 0 : i64, tpu.core_type = #tpu.core_type<tc>, window_params = [{transform_indices = @transform_0, window_bounds = array<i64: 1, 8, 32>}, {transform_indices = @transform_1, window_bounds = array<i64: 1, 1, 1, 8>}, {pipeline_mode = #tpu.pipeline_mode<synchronous>, transform_indices = @transform_2, window_bounds = array<i64: 32, 32>}, {pipeline_mode = #tpu.pipeline_mode<synchronous>, transform_indices = @transform_3, window_bounds = array<i64: 1, 32>}, {pipeline_mode = #tpu.pipeline_mode<synchronous>, transform_indices = @transform_4, window_bounds = array<i64: 32, 32>}, {pipeline_mode = #tpu.pipeline_mode<synchronous>, transform_indices = @transform_5, window_bounds = array<i64: 1, 32>}, {pipeline_mode = #tpu.pipeline_mode<synchronous>, transform_indices = @transform_6, window_bounds = array<i64: 32, 32>}, {pipeline_mode = #tpu.pipeline_mode<synchronous>, transform_indices = @transform_7, window_bounds = array<i64: 1, 32>}, {transform_indices = @transform_8, window_bounds = array<i64: 1, 8, 32>}]} {
    %c0 = arith.constant 0 : index
    %c0_0 = arith.constant 0 : index
    %c0_1 = arith.constant 0 : index
    %0 = vector.load %arg1[%c0, %c0_0, %c0_1] : memref<1x8x32xbf16, #tpu.memory_space<vmem>>, vector<1x8x32xbf16>
    %1 = vector.shape_cast %0 : vector<1x8x32xbf16> to vector<8x32xbf16>
    %c0_2 = arith.constant 0 : index
    %c0_3 = arith.constant 0 : index
    %2 = vector.load %arg3[%c0_2, %c0_3] : memref<32x32xbf16, #tpu.memory_space<vmem>>, vector<32x32xbf16>
    %cst = arith.constant dense<0.000000e+00> : vector<8x32xf32>
    %3 = tpu.matmul %1, %2, %cst {dimension_numbers = #tpu.dot_dimension_numbers<[1], [0], [0], [1], [0, 0, 1, 1], [], []>} : vector<8x32xbf16>, vector<32x32xbf16>, vector<8x32xf32> -> vector<8x32xf32>
    %c0_4 = arith.constant 0 : index
    %c0_5 = arith.constant 0 : index
    %4 = vector.load %arg4[%c0_4, %c0_5] : memref<1x32xf32, #tpu.memory_space<vmem>>, vector<1x32xf32>
    %5 = vector.broadcast %4 : vector<1x32xf32> to vector<8x32xf32>
    %6 = arith.addf %3, %5 : vector<8x32xf32>
    %c0_6 = arith.constant 0 : index
    %c0_7 = arith.constant 0 : index
    %7 = vector.load %arg5[%c0_6, %c0_7] : memref<32x32xbf16, #tpu.memory_space<vmem>>, vector<32x32xbf16>
    %cst_8 = arith.constant dense<0.000000e+00> : vector<8x32xf32>
    %8 = tpu.matmul %1, %7, %cst_8 {dimension_numbers = #tpu.dot_dimension_numbers<[1], [0], [0], [1], [0, 0, 1, 1], [], []>} : vector<8x32xbf16>, vector<32x32xbf16>, vector<8x32xf32> -> vector<8x32xf32>
    %c0_9 = arith.constant 0 : index
    %c0_10 = arith.constant 0 : index
    %9 = vector.load %arg6[%c0_9, %c0_10] : memref<1x32xf32, #tpu.memory_space<vmem>>, vector<1x32xf32>
    %10 = vector.broadcast %9 : vector<1x32xf32> to vector<8x32xf32>
    %11 = arith.addf %8, %10 : vector<8x32xf32>
    %c0_11 = arith.constant 0 : index
    %c0_12 = arith.constant 0 : index
    %12 = vector.load %arg7[%c0_11, %c0_12] : memref<32x32xbf16, #tpu.memory_space<vmem>>, vector<32x32xbf16>
    %cst_13 = arith.constant dense<0.000000e+00> : vector<8x32xf32>
    %13 = tpu.matmul %1, %12, %cst_13 {dimension_numbers = #tpu.dot_dimension_numbers<[1], [0], [0], [1], [0, 0, 1, 1], [], []>} : vector<8x32xbf16>, vector<32x32xbf16>, vector<8x32xf32> -> vector<8x32xf32>
    %c0_14 = arith.constant 0 : index
    %c0_15 = arith.constant 0 : index
    %14 = vector.load %arg8[%c0_14, %c0_15] : memref<1x32xf32, #tpu.memory_space<vmem>>, vector<1x32xf32>
    %15 = vector.broadcast %14 : vector<1x32xf32> to vector<8x32xf32>
    %16 = arith.addf %13, %15 : vector<8x32xf32>
    %cst_16 = arith.constant 2.500000e-01 : f32
    %17 = vector.broadcast %cst_16 : f32 to vector<8x32xf32>
    %18 = arith.mulf %6, %17 : vector<8x32xf32>
    %19 = arith.truncf %18 : vector<8x32xf32> to vector<8x32xbf16>
    %20 = arith.truncf %11 : vector<8x32xf32> to vector<8x32xbf16>
    %21 = arith.truncf %16 : vector<8x32xf32> to vector<8x32xbf16>
    %c0_17 = arith.constant 0 : index
    %c0_18 = arith.constant 0 : index
    %c0_19 = arith.constant 0 : index
    %c0_20 = arith.constant 0 : index
    %22 = vector.load %arg2[%c0_17, %c0_18, %c0_19, %c0_20] : memref<1x1x1x8xf32, #tpu.memory_space<vmem>>, vector<1x1x1x8xf32>
    %23 = vector.shape_cast %22 : vector<1x1x1x8xf32> to vector<1x8xf32>
    %24 = vector.shape_cast %23 : vector<1x8xf32> to vector<1x8xf32>
    %25 = vector.broadcast %24 : vector<1x8xf32> to vector<8x8xf32>
    %26 = vector.extract_strided_slice %19 {offsets = [0, 0], sizes = [8, 16], strides = [1, 1]} : vector<8x32xbf16> to vector<8x16xbf16>
    %27 = vector.extract_strided_slice %20 {offsets = [0, 0], sizes = [8, 16], strides = [1, 1]} : vector<8x32xbf16> to vector<8x16xbf16>
    %28 = vector.extract_strided_slice %21 {offsets = [0, 0], sizes = [8, 16], strides = [1, 1]} : vector<8x32xbf16> to vector<8x16xbf16>
    %cst_21 = arith.constant dense<0.000000e+00> : vector<8x8xf32>
    %29 = tpu.matmul %26, %27, %cst_21 {dimension_numbers = #tpu.dot_dimension_numbers<[1], [1], [0], [0], [0, 0, 1, 0], [], []>} : vector<8x16xbf16>, vector<8x16xbf16>, vector<8x8xf32> -> vector<8x8xf32>
    %30 = arith.addf %29, %25 : vector<8x8xf32>
    %cst_22 = arith.constant dense<0xFF800000> : vector<8xf32>
    %31 = vector.multi_reduction <maximumf>, %30, %cst_22 [1] : vector<8x8xf32> to vector<8xf32>
    %32 = vector.shape_cast %31 : vector<8xf32> to vector<8x1xf32>
    %33 = vector.broadcast %32 : vector<8x1xf32> to vector<8x8xf32>
    %34 = arith.subf %30, %33 : vector<8x8xf32>
    %35 = math.exp %34 : vector<8x8xf32>
    %cst_23 = arith.constant dense<0.000000e+00> : vector<8xf32>
    %36 = vector.multi_reduction <add>, %35, %cst_23 [1] : vector<8x8xf32> to vector<8xf32>
    %37 = vector.shape_cast %36 : vector<8xf32> to vector<8x1xf32>
    %38 = tpu.reciprocal %37 {approx = true} : vector<8x1xf32> -> vector<8x1xf32>
    %39 = vector.broadcast %38 : vector<8x1xf32> to vector<8x8xf32>
    %40 = arith.mulf %35, %39 : vector<8x8xf32>
    %41 = arith.truncf %40 : vector<8x8xf32> to vector<8x8xbf16>
    %cst_24 = arith.constant dense<0.000000e+00> : vector<8x16xf32>
    %42 = tpu.matmul %41, %28, %cst_24 {dimension_numbers = #tpu.dot_dimension_numbers<[1], [0], [0], [1], [0, 0, 1, 1], [], []>} : vector<8x8xbf16>, vector<8x16xbf16>, vector<8x16xf32> -> vector<8x16xf32>
    %43 = vector.extract_strided_slice %19 {offsets = [0, 16], sizes = [8, 16], strides = [1, 1]} : vector<8x32xbf16> to vector<8x16xbf16>
    %44 = vector.extract_strided_slice %20 {offsets = [0, 16], sizes = [8, 16], strides = [1, 1]} : vector<8x32xbf16> to vector<8x16xbf16>
    %45 = vector.extract_strided_slice %21 {offsets = [0, 16], sizes = [8, 16], strides = [1, 1]} : vector<8x32xbf16> to vector<8x16xbf16>
    %cst_25 = arith.constant dense<0.000000e+00> : vector<8x8xf32>
    %46 = tpu.matmul %43, %44, %cst_25 {dimension_numbers = #tpu.dot_dimension_numbers<[1], [1], [0], [0], [0, 0, 1, 0], [], []>} : vector<8x16xbf16>, vector<8x16xbf16>, vector<8x8xf32> -> vector<8x8xf32>
    %47 = arith.addf %46, %25 : vector<8x8xf32>
    %cst_26 = arith.constant dense<0xFF800000> : vector<8xf32>
    %48 = vector.multi_reduction <maximumf>, %47, %cst_26 [1] : vector<8x8xf32> to vector<8xf32>
    %49 = vector.shape_cast %48 : vector<8xf32> to vector<8x1xf32>
    %50 = vector.broadcast %49 : vector<8x1xf32> to vector<8x8xf32>
    %51 = arith.subf %47, %50 : vector<8x8xf32>
    %52 = math.exp %51 : vector<8x8xf32>
    %cst_27 = arith.constant dense<0.000000e+00> : vector<8xf32>
    %53 = vector.multi_reduction <add>, %52, %cst_27 [1] : vector<8x8xf32> to vector<8xf32>
    %54 = vector.shape_cast %53 : vector<8xf32> to vector<8x1xf32>
    %55 = tpu.reciprocal %54 {approx = true} : vector<8x1xf32> -> vector<8x1xf32>
    %56 = vector.broadcast %55 : vector<8x1xf32> to vector<8x8xf32>
    %57 = arith.mulf %52, %56 : vector<8x8xf32>
    %58 = arith.truncf %57 : vector<8x8xf32> to vector<8x8xbf16>
    %cst_28 = arith.constant dense<0.000000e+00> : vector<8x16xf32>
    %59 = tpu.matmul %58, %45, %cst_28 {dimension_numbers = #tpu.dot_dimension_numbers<[1], [0], [0], [1], [0, 0, 1, 1], [], []>} : vector<8x8xbf16>, vector<8x16xbf16>, vector<8x16xf32> -> vector<8x16xf32>
    %60 = tpu.concatenate %42, %59 in 1 : vector<8x16xf32>, vector<8x16xf32> -> vector<8x32xf32>
    %c0_29 = arith.constant 0 : index
    %c0_30 = arith.constant 0 : index
    %c0_31 = arith.constant 0 : index
    %61 = vector.load %arg9[%c0_29, %c0_30, %c0_31] : memref<1x8x32xf32, #tpu.memory_space<vmem>>, vector<1x8x32xf32>
    %62 = vector.shape_cast %61 : vector<1x8x32xf32> to vector<8x32xf32>
    %63 = vector.shape_cast %60 : vector<8x32xf32> to vector<1x8x32xf32>
    tpu.vector_store %arg9[%c0_29, %c0_30, %c0_31], %63 {strides = array<i32>} : memref<1x8x32xf32, #tpu.memory_space<vmem>>, vector<1x8x32xf32>,
    return
  }
  func.func @transform_0(%arg0: i32) -> (i32, i32, i32) {
    %c0_i32 = arith.constant 0 : i32
    %c0_i32_0 = arith.constant 0 : i32
    %c0_i32_1 = arith.constant 0 : i32
    return %arg0, %c0_i32, %c0_i32_0 : i32, i32, i32
  }
  func.func @transform_1(%arg0: i32) -> (i32, i32, i32, i32) {
    %c0_i32 = arith.constant 0 : i32
    %c0_i32_0 = arith.constant 0 : i32
    %c0_i32_1 = arith.constant 0 : i32
    %c0_i32_2 = arith.constant 0 : i32
    return %arg0, %c0_i32, %c0_i32_0, %c0_i32_1 : i32, i32, i32, i32
  }
  func.func @transform_2(%arg0: i32) -> (i32, i32) {
    %c0_i32 = arith.constant 0 : i32
    %c0_i32_0 = arith.constant 0 : i32
    %c0_i32_1 = arith.constant 0 : i32
    return %c0_i32, %c0_i32_0 : i32, i32
  }
  func.func @transform_3(%arg0: i32) -> (i32, i32) {
    %c0_i32 = arith.constant 0 : i32
    %c0_i32_0 = arith.constant 0 : i32
    %c0_i32_1 = arith.constant 0 : i32
    return %c0_i32, %c0_i32_0 : i32, i32
  }
  func.func @transform_4(%arg0: i32) -> (i32, i32) {
    %c0_i32 = arith.constant 0 : i32
    %c0_i32_0 = arith.constant 0 : i32
    %c0_i32_1 = arith.constant 0 : i32
    return %c0_i32, %c0_i32_0 : i32, i32
  }
  func.func @transform_5(%arg0: i32) -> (i32, i32) {
    %c0_i32 = arith.constant 0 : i32
    %c0_i32_0 = arith.constant 0 : i32
    %c0_i32_1 = arith.constant 0 : i32
    return %c0_i32, %c0_i32_0 : i32, i32
  }
  func.func @transform_6(%arg0: i32) -> (i32, i32) {
    %c0_i32 = arith.constant 0 : i32
    %c0_i32_0 = arith.constant 0 : i32
    %c0_i32_1 = arith.constant 0 : i32
    return %c0_i32, %c0_i32_0 : i32, i32
  }
  func.func @transform_7(%arg0: i32) -> (i32, i32) {
    %c0_i32 = arith.constant 0 : i32
    %c0_i32_0 = arith.constant 0 : i32
    %c0_i32_1 = arith.constant 0 : i32
    return %c0_i32, %c0_i32_0 : i32, i32
  }
  func.func @transform_8(%arg0: i32) -> (i32, i32, i32) {
    %c0_i32 = arith.constant 0 : i32
    %c0_i32_0 = arith.constant 0 : i32
    %c0_i32_1 = arith.constant 0 : i32
    return %arg0, %c0_i32, %c0_i32_0 : i32, i32, i32
  }
}

</mosaic_0001>

<bundles_post_ra>
// kernel: tpu_custom_call.1
= control target key start
LH: loop header
LB: loop body
LE: loop exit
PB: predicated region body
PF: predicated region fallthrough
CT: control target
= control target key end

     0   :  { %13 = vsyncpa [#allocation3], 0  ;;  %s1600_s0 = inlined_call_operand.hbm [shape: bf16[2,8,32], index: 0, kind: input, shape index: {}]   ;;  %s1601_s1 = inlined_call_operand.vmem [shape: f32[2,1,1,8], index: 1, kind: input, shape index: {}]   ;;  %s1602_s2 = inlined_call_operand.hbm [shape: bf16[32,32], index: 2, kind: input, shape index: {}]   ;;  %s1603_s3 = inlined_call_operand.vmem [shape: f32[1,32], index: 3, kind: input, shape index: {}]   ;;  %s1604_s4 = inlined_call_operand.hbm [shape: bf16[32,32], index: 4, kind: input, shape index: {}]   ;;  %s1605_s5 = inlined_call_operand.vmem [shape: f32[1,32], index: 5, kind: input, shape index: {}]   ;;  %s1606_s6 = inlined_call_operand.vmem [shape: bf16[32,32], index: 6, kind: input, shape index: {}]   ;;  %s1607_s7 = inlined_call_operand.vmem [shape: f32[1,32], index: 7, kind: input, shape index: {}]   ;;  %s1608_s8 = inlined_call_operand.hbm [shape: f32[2,8,32], index: 8, kind: output, shape index: {}]  }
   0x1   :  { %15 = vsyncpa [#allocation3 + $0x1], 0 }
   0x2   :  { %16 = vsyncpa [#allocation6], 0 }
   0x3   :  { %17 = vsyncpa [#allocation4], 0 }
   0x4   :  { %19 = vsyncpa [#allocation4 + $0x1], 0  ;;  %s1306_s27 = smov 0   ;;  %s1308_s28 = smov 0  }
   0x5   :  { %s1310_s29 = smov 0   ;;  %s1312_s30 = smov 0  }
   0x6 LB: > { %s1327_s9 = sadd.s32 4294967295, %s1249_s30   ;;  %s908_s10 = sadd.s32 4294967294, %s1249_s30   ;;  %s1249_s30 = sphi %s1312_s30, %s1628_s30   ;;  %s1245_s29 = sphi %s1310_s29, %s1627_s29   ;;  %s1241_s28 = sphi %s1308_s28, %s1626_s28   ;;  %s1237_s27 = sphi %s1306_s27, %s1625_s27  }
   0x7   : > { %p45_p0 = scmp.ne.s32.totalorder %s1241_s28, %s1237_s27  ;;  %p1609_p1 = scmp.eq.s32.totalorder %s1327_s9, 0 }
   0x8   : > { %p227_p3 = scmp.eq.s32.totalorder %s908_s10, 1  ;;  %p909_p5 = scmp.ge.s32.totalorder %s1249_s30, 1 }
   0x9   : > { %p1336_p4 = por %p1609_p1, %p45_p0  ;;  %p234_p7 = scmp.lt.s32.totalorder %s1249_s30, 3 }
   0xa   : > { %p1341_p6 = por %p227_p3, %p45_p0  ;;  %s1251_s14 = smov [#allocation5]  }
   0xb   : > { %s1612_s11 = scalar_select %p1336_p4, 1, 0 }
   0xc   : > { %s1613_s12 = scalar_select %p1341_p6, 1, 0 }
   0xd   : > { %p1346_p8 = pnand %p909_p5, %p234_p7  ;;  %s246_s15 = sshll.u32 %s1251_s14, 4  ;;  %s1350_s15 = int_to_ptr.vmem [resolvable:$true] %s246_s15 }
   0xe   : > { %s1252_s17 = smov [#allocation7]   ;;  %s1093_s21 = scalar_lea.hbm %s1602_s2, 256 }
   0xf   : > { %p1018_p9 = pneg %p1346_p8  ;;  %s262_s18 = sshll.u32 %s1252_s17, 4  ;;  %s1361_s18 = int_to_ptr.vmem [resolvable:$true] %s262_s18 }
  0x10   : > { %p1094_p12 = scmp.ne.s32.totalorder %s1602_s2, %s1093_s21  ;;  %p1100_p5 = scmp.lt.u32.totalorder %s1093_s21, %s1602_s2 }
  0x11   : > { %p1357_p11 = pnand %p1018_p9, %p1609_p1 }
  0x13   : > { %p1095_p13 = pneg %p1357_p11 }
  0x15   : > { %p1096_p0 = pnand %p1095_p13, %p1094_p12 }
  0x17   : > { %p1097_p3 = pneg %p1096_p0 }
  0x19   : > { %p1102_p7 = pnand %p1100_p5, %p1097_p3 }
  0x1b   : > { %1105 = shalt.err (!%p1102_p7)
}
  0x1c   : > { %s1106_s26 = scalar_lea.vmem %s1350_s15, 256  ;;  %p1114_p2 = scmp.lt.s32.totalorder %s1350_s15, %s1350_s15 }
  0x1d   : > { %p1107_p9 = scmp.ne.s32.totalorder %s1350_s15, %s1106_s26  ;;  %p1115_p12 = scmp.lt.s32.totalorder %s1106_s26, %s1106_s26 }
  0x1f   : > { %p1109_p10 = pnand %p1107_p9, %p1095_p13  ;;  %p1116_p0 = por %p1115_p12, %p1114_p2 }
  0x21   : > { %p1110_p1 = pneg %p1109_p10 }
  0x23   : > { %p1117_p6 = pnand %p1116_p0, %p1110_p1 }
  0x25   : > { %1120 = shalt.err (!%p1117_p6)
}
  0x26   : > { %s1253_s10 = smov 64   ;;  %s1254_s14 = smov 4  }
  0x27   : > { %1021 = dma.hbm_to_vmem [thread:$0]  (!%p1357_p11), %s1602_s2, 256, %s1350_s15, [#allocation6], %s1253_s10, %s1253_s10, %s1254_s14  }
  0x28   : > { %s1121_s22 = scalar_lea.hbm %s1604_s4, 256 }
  0x29   : > { %p1122_p2 = scmp.ne.s32.totalorder %s1604_s4, %s1121_s22  ;;  %p1128_p10 = scmp.lt.u32.totalorder %s1121_s22, %s1604_s4 }
  0x2b   : > { %p1124_p1 = pnand %p1122_p2, %p1095_p13 }
  0x2d   : > { %p1125_p6 = pneg %p1124_p1 }
  0x2f   : > { %p1130_p3 = pnand %p1128_p10, %p1125_p6 }
  0x31   : > { %1133 = shalt.err (!%p1130_p3)
}
  0x32   : > { %s1134_s15 = scalar_lea.vmem %s1361_s18, 256  ;;  %p1142_p12 = scmp.lt.s32.totalorder %s1361_s18, %s1361_s18 }
  0x33   : > { %p1135_p5 = scmp.ne.s32.totalorder %s1361_s18, %s1134_s15  ;;  %p1143_p0 = scmp.lt.s32.totalorder %s1134_s15, %s1134_s15 }
  0x35   : > { %p1137_p7 = pnand %p1135_p5, %p1095_p13  ;;  %p1144_p2 = por %p1143_p0, %p1142_p12 }
  0x37   : > { %p1138_p9 = pneg %p1137_p7 }
  0x39   : > { %p1145_p1 = pnand %p1144_p2, %p1138_p9 }
  0x3b   : > { %1148 = shalt.err (!%p1145_p1)
}
  0x3c   : > { %1024 = dma.hbm_to_vmem [thread:$0]  (!%p1357_p11), %s1604_s4, 256, %s1361_s18, [#allocation6], %s1253_s10, %s1253_s10, %s1254_s14  }
  0x3d   : > { %s1416_s20 = sadd.s32 1, %s1249_s30   ;;  %s32_s16 = sadd.s32 1, %s1245_s29 }
  0x3e   : > { %s29_s21 = ssub.s32 %s1249_s30, %s1416_s20  ;;  %p39_p13 = scmp.ne.s32.totalorder %s1245_s29, %s1241_s28 }
  0x3f   : > { %p30_p6 = scmp.eq.s32.totalorder %s29_s21, 0  ;;  %p40_p10 = scmp.eq.s32.totalorder %s1249_s30, 0 }
  0x40   : > { %p1616_p3 = scmp.eq.s32.totalorder %s1327_s9, 1  ;;  %p1035_p7 = scmp.lt.s32.totalorder %s1249_s30, 2 }
  0x41   : > { %s1432_s23 = scalar_select %p30_p6, %s1245_s29, %s32_s16  }
  0x42   : > { %p1426_p5 = por %p1616_p3, %p39_p13  ;;  %p41_p9 = por %p40_p10, %p39_p13 }
  0x43   : > { %s285_s24 = sand.u32 1, %s1245_s29   ;;  %s914_s18 = sshll.u32 %s1249_s30, 6 }
  0x44   : > { %s1617_s22 = scalar_select %p1426_p5, 1, 0 }
  0x45   : > { %s913_s25 = sshll.u32 %s285_s24, 2  ;;  %s1439_s26 = scalar_lea.hbm %s1600_s0, %s914_s18 }
  0x46   : > { %s289_s15 = scalar_lea.vmem [#allocation2], %s913_s25  ;;  %p1443_p11 = pnand %p1035_p7, %p41_p9 }
  0x47   : > { %s296_s17 = sshll.u32 %s289_s15, 4  ;;  %s286_s16 = scalar_lea.sflag [#allocation3], %s285_s24  ;;  %s1441_s17 = int_to_ptr.vmem [resolvable:$true] %s296_s17 }
  0x48   : > { %s1149_s21 = scalar_lea.hbm %s1439_s26, 64  ;;  %p1151_p0 = pneg %p1443_p11 }
  0x49   : > { %p1150_p12 = scmp.ne.s32.totalorder %s1439_s26, %s1149_s21  ;;  %s1154_s10 = scalar_lea.hbm %s1600_s0, 128 }
  0x4a   : > { %p1155_p13 = scmp.lt.u32.totalorder %s1439_s26, %s1600_s0  ;;  %p1156_p6 = scmp.lt.u32.totalorder %s1154_s10, %s1149_s21 }
  0x4b   : > { %p1152_p2 = pnand %p1151_p0, %p1150_p12  ;;  %p1158_p3 = scmp.lt.u32.totalorder %s1149_s21, %s1439_s26 }
  0x4c   : > { %p1157_p10 = por %p1156_p6, %p1155_p13 }
  0x4d   : > { %p1153_p1 = pneg %p1152_p2 }
  0x4e   : > { %p1159_p7 = por %p1158_p3, %p1157_p10 }
  0x50   : > { %p1160_p9 = pnand %p1159_p7, %p1153_p1 }
  0x52   : > { %1163 = shalt.err (!%p1160_p9)
}
  0x53   : > { %s1164_s24 = scalar_lea.vmem %s1441_s17, 64  ;;  %s1255_s18 = smov [#allocation2]  }
  0x54   : > { %p1165_p12 = scmp.ne.s32.totalorder %s1441_s17, %s1164_s24  ;;  %s1169_s25 = sshll.u32 %s1255_s18, 4  ;;  %s1170_s25 = int_to_ptr.vmem [resolvable:$false] %s1169_s25 }
  0x55   : > { %s1171_s14 = scalar_lea.vmem %s1170_s25, 128  ;;  %p1172_p4 = scmp.lt.s32.totalorder %s1441_s17, %s1170_s25 }
  0x56   : > { %p1167_p2 = pnand %p1165_p12, %p1151_p0  ;;  %p1173_p13 = scmp.lt.s32.totalorder %s1171_s14, %s1164_s24 }
  0x58   : > { %p1168_p5 = pneg %p1167_p2  ;;  %p1174_p6 = por %p1173_p13, %p1172_p4 }
  0x5a   : > { %p1175_p10 = pnand %p1174_p6, %p1168_p5 }
  0x5c   : > { %1178 = shalt.err (!%p1175_p10)
}
  0x5d   : > { %1028 = dma.hbm_to_vmem [thread:$0]  (!%p1443_p11), %s1439_s26, 64, %s1441_s17, %s286_s16  }
  0x5e   : > { %311 = sbr.rel (%p1346_p8) target bundleno = 1326 (0x52e), region = 52  ;;  %s1475_s21 = sand.u32 (!%p1346_p8), 1, %s1241_s28  }
  0x5f   : > { %s916_s10 = sshll.u32 (!%p1346_p8), %s1475_s21, 2  ;;  %s314_s15 = scalar_lea.sflag (!%p1346_p8), [#allocation3], %s1475_s21 }
  0x60   : > { %s317_s24 = scalar_lea.vmem (!%p1346_p8), [#allocation2], %s916_s10  ;;  %p1619_p4 = scmp.ne.s32.totalorder (!%p1346_p8), %s1612_s11, 0 }
  0x65   : > { %1224 = dma.done.wait (%p1619_p4), %s314_s15, 64  }
  0x66   : > { %1226 = vsyncadd (%p1619_p4), %s314_s15, 4294967232  ;;  %p1620_p5 = scmp.eq.s32.totalorder %s1327_s9, 0 }
  0x68   : > { %1228 = dma.done.wait (%p1620_p5), [#allocation6], 512   ;;  %p1621_p11 = pmov %p1620_p5 }
  0x69   : > { %v1256_v0 = vmov 0.0   ;;  %vm1257_vm0 = vmmov 0   ;;  %v1079_v1 = vld [vmem:[#allocation7] sm:$0xff]   ;;  %v1080_v2 = vld [vmem:[#allocation5] sm:$0xff]   ;;  %v1081_v3 = vld [vmem:[#allocation7 + $0x8] sm:$0xff]   ;;  %vm389_vm1 = vcmask 261120  }
  0x6a   : > { %1230 = vsyncadd (%p1621_p11), [#allocation6], 4294966784  ;;  %966 = vmatprep.subr.bf16.mxu1 %v1256_v0  ;;  %958 = vmatprep.subr.bf16.mxu0 %v1256_v0  ;;  %v1082_v4 = vld [vmem:[#allocation5 + $0x8] sm:$0xff]   ;;  %v365_v5 = vld [vmem:[%s317_s24] sm:$0xf]  ;;  %vm570_vm2 = vcmask 130048  }
  0x6b   : > { %970 = vmatprep.mubr.msk.bf16.mxu1 %vm1257_vm0, %v1256_v0  ;;  %962 = vmatprep.mubr.msk.bf16.mxu0 %vm1257_vm0, %v1256_v0  ;;  %v924_v6 = vld [vmem:[%s1605_s5] ss:$0 sm:$0xff]  ;;  %s1258_s19 = smov 112   ;;  %v1084_v23 = vld [vmem:[%s1606_s6 + $0x8] sm:$0xff]   ;;  %p361_p8 = scmp.lt.s32.totalorder %s1327_s9, 1  ;;  %vm617_vm3 = vcmask 64512  }
  0x6c   : > { %967 = vmatpush3.bf16.msra.mxu1 %v1079_v1  ;;  %959 = vmatpush3.bf16.msra.mxu0 %v1080_v2  ;;  %v920_v7 = vld [vmem:[%s1603_s3] ss:$0 sm:$0xff]  ;;  %vm633_vm4 = vcmask 1043456   ;;  %s1259_s17 = smov 16   ;;  %s938_s16 = sshll.u32 %s1327_s9, 7 }
  0x6d   : > { %968 = vmatprep.subr.bf16.mxu1 %v1256_v0  ;;  %960 = vmatprep.subr.bf16.mxu0 %v1256_v0  ;;  %v1083_v22 = vld [vmem:[%s1606_s6] sm:$0xff]   ;;  %s362_s10 = scalar_select %p361_p8, %s1327_s9, 1 }
  0x6e   : > { %v928_v48 = vld [vmem:[%s1607_s7] ss:$0 sm:$0xff]  ;;  %s1554_s15 = scalar_lea.hbm %s1608_s8, %s938_s16  ;;  %s797_s24 = scalar_lea.sflag [#allocation4], %s1475_s21 }
  0x6f   : > { %s363_s11 = scalar_lea.vmem %s1601_s1, %s362_s10  ;;  %p1622_p1 = scmp.ne.s32.totalorder %s1617_s22, 0 }
  0x70   : > { %969 = vmatpush3.bf16.msra.mxu1 %v1081_v3  ;;  %961 = vmatpush3.bf16.msra.mxu0 %v1082_v4  ;;  %v932_v27 = vld [vmem:[%s363_s11] ss:$0 sm:$0xff]  ;;  %s1260_s9 = smov [#allocation8]  }
  0x71   : > { %982 = vmatprep.subr.bf16.mxu1 %v1256_v0  ;;  %974 = vmatprep.subr.bf16.mxu0 %v1256_v0  ;;  %s1183_s13 = sshll.u32 %s1260_s9, 4  ;;  %s1184_s13 = int_to_ptr.vmem [resolvable:$false] %s1183_s13 }
  0x72   : > { %s1185_s26 = scalar_lea.vmem %s1184_s13, 256 }
  0x73   : > { %971 = vmatmul.mubr.msk.bf16.vlgmr.msra.gmra.mrb[0].mxu1 %vm389_vm1, %v365_v5  ;;  %963 = vmatmul.mubr.msk.bf16.vlgmr.msra.gmra.mrb[0].mxu0 %vm389_vm1, %v365_v5 }
  0x74   : > { %984 = vmatprep.mubr.msk.bf16.mxu1 %vm1257_vm0, %v1256_v0  ;;  %978 = vmatprep.mubr.msk.bf16.mxu0 %vm1257_vm0, %v1256_v0 }
  0x75   : > { %975 = vmatpush3.bf16.msra.mxu0 %v1083_v22 }
  0x76   : > { %976 = vmatprep.subr.bf16.mxu0 %v1256_v0 }
  0x79   : > { %977 = vmatpush3.bf16.msra.mxu0 %v1084_v23 }
  0x7a   : > { %988 = vmatprep.subr.bf16.mxu0 %v1256_v0 }
  0x7c   : > { %979 = vmatmul.mubr.msk.bf16.vlgmr.msra.gmra.mrb[4].mxu0 %vm389_vm1, %v365_v5 }
  0x7d   : > { %990 = vmatprep.mubr.msk.bf16.mxu0 %vm1257_vm0, %v1256_v0 }
 0x146   : > { %v490_v8 = vpop.f32.mrb[0].mxu1  ;;  %v427_v11 = vpop.f32.mrb[0].mxu0 }
 0x147   : > { %v491_v9 = vadd.f32 %v924_v6, %v490_v8  ;;  %v972_v10 = vpop.f32.mrb[1].mxu1  ;;  %v428_v13 = vadd.f32 %v920_v7, %v427_v11  ;;  %v964_v14 = vpop.f32.mrb[1].mxu0 }
 0x148   : > { %v493_v12 = vpop.f32.mrb[2].mxu1  ;;  %v430_v17 = vpop.f32.mrb[2].mxu0 }
 0x149   : > { %v561_v15 = vpack.c.bf16 %v491_v9, %v491_v9  ;;  %v973_v16 = vpop.f32.mrb[3].mxu1  ;;  %v559_v18 = vmul.f32 0.25, %v428_v13  ;;  %v965_v19 = vpop.f32.mrb[3].mxu0 }
 0x14b   : > { %v575_v20 = vsel %vm570_vm2, %v561_v15, 0  ;;  %681 = vrot.lane.b32.xlu0 %v561_v15, %s1258_s19  ;;  %v560_v21 = vpack.c.bf16 %v559_v18, %v559_v18 }
 0x14c   : > { %983 = vmatpush3.bf16.xpose.msra.mxu1 %v575_v20 }
 0x14d   : > { %994 = vmatprep.subr.bf16.mxu1 %v1256_v0 }
 0x14f   : > { %678 = vrot.lane.b32.xlu0 %v560_v21, %s1258_s19  ;;  %v553_v45 = vpop.f32.mrb[4].mxu0 }
 0x150   : > { %v980_v46 = vpop.f32.mrb[5].mxu0  ;;  %v554_v50 = vadd.f32 %v928_v48, %v553_v45 }
 0x151   : > { %v556_v47 = vpop.f32.mrb[6].mxu0 }
 0x152   : > { %v981_v49 = vpop.f32.mrb[7].mxu0  ;;  %v562_v51 = vpack.c.bf16 %v554_v50, %v554_v50 }
 0x153   : > { %985 = vmatmul.mubr.msk.bf16.vlgmr.msra.gmra.mrb[4].mxu1 %vm570_vm2, %v560_v21 }
 0x154   : > { %996 = vmatprep.mubr.msk.bf16.mxu1 %vm1257_vm0, %v1256_v0  ;;  %v635_v52 = vsel %vm633_vm4, %v562_v51, 0 }
 0x155   : > { %989 = vmatpush3.bf16.msra.mxu0 %v635_v52 }
 0x156   : > { %1000 = vmatprep.subr.bf16.mxu0 %v1256_v0 }
 0x1bd   : > { %v682_v24 = vpop.permute.xlu0 %681 }
 0x1be   : > { %v687_v25 = vsel %vm570_vm2, %v682_v24, 0 }
 0x1bf   : > { %995 = vmatpush3.bf16.xpose.msra.mxu1 %v687_v25 }
 0x1c1   : > { %v679_v26 = vpop.permute.xlu0 %678 }
 0x1c6   : > { %997 = vmatmul.mubr.msk.bf16.vlgmr.msra.gmra.mrb[8].mxu1 %vm570_vm2, %v679_v26 }
 0x226   : > { %v611_v28 = vpop.f32.mrb[4].mxu1 }
 0x227   : > { %v612_v29 = vadd.f32 %v932_v27, %v611_v28  ;;  %v986_v30 = vpop.f32.mrb[5].mxu1 }
 0x228   : > { %v614_v31 = vpop.f32.mrb[6].mxu1 }
 0x229   : > { %v987_v32 = vpop.f32.mrb[7].mxu1  ;;  %v618_v33 = vsel %vm617_vm3, %v612_v29, -inf }
 0x22a   : > { %619 = vmax.xlane.f32.xlu1 %v618_v33 }
 0x299   : > { %v723_v34 = vpop.f32.mrb[8].mxu1 }
 0x29a   : > { %v724_v35 = vadd.f32 %v932_v27, %v723_v34  ;;  %v998_v36 = vpop.f32.mrb[9].mxu1 }
 0x29b   : > { %v726_v37 = vpop.f32.mrb[10].mxu1 }
 0x29c   : > { %v999_v38 = vpop.f32.mrb[11].mxu1  ;;  %v729_v39 = vsel %vm617_vm3, %v724_v35, -inf }
 0x29d   : > { %730 = vmax.xlane.f32.xlu1 %v729_v39 }
 0x2b7   : > { %v620_v40 = vpop.xlane.xlu1 %619 }
 0x2b8   : > { %v621_v41 = vsub.f32 %v612_v29, %v620_v40 }
 0x2ba   : > { %v622_v42 = vmul.f32 1.442695, %v621_v41 }
 0x2bc   : > { %1085 = vpow2.f32 %v622_v42 }
 0x2c6   : > { %v1086_v43 = vpop.eup %1085 }
 0x2c7   : > { %v624_v44 = vsel %vm617_vm3, %v1086_v43, 0.0 }
 0x2c8   : > { %625 = vadd.xlane.f32.xlu0 %v624_v44 }
 0x32a   : > { %v731_v53 = vpop.xlane.xlu1 %730 }
 0x32b   : > { %v732_v54 = vsub.f32 %v724_v35, %v731_v53 }
 0x32d   : > { %v733_v55 = vmul.f32 1.442695, %v732_v54 }
 0x32f   : > { %1087 = vpow2.f32 %v733_v55 }
 0x339   : > { %v1088_v56 = vpop.eup %1087 }
 0x33a   : > { %v735_v57 = vsel %vm617_vm3, %v1088_v56, 0.0 }
 0x33b   : > { %736 = vadd.xlane.f32.xlu1 %v735_v57 }
 0x34c   : > { %742 = vrot.lane.b32.xlu1 %v562_v51, %s1258_s19  ;;  %s919_s19 = sshll.u32 %s1475_s21, 3 }
 0x34d   : > { %s360_s18 = scalar_lea.vmem [#allocation8], %s919_s19 }
 0x34e   : > { %s810_s25 = sshll.u32 %s360_s18, 4  ;;  %s1556_s25 = int_to_ptr.vmem [resolvable:$true] %s810_s25 }
 0x34f   : > { %s1179_s11 = scalar_lea.vmem %s1556_s25, 128  ;;  %p1186_p9 = scmp.lt.s32.totalorder %s1556_s25, %s1184_s13 }
 0x350   : > { %p1180_p0 = scmp.ne.s32.totalorder %s1556_s25, %s1179_s11  ;;  %p1187_p12 = scmp.lt.s32.totalorder %s1185_s26, %s1179_s11 }
 0x352   : > { %p1181_p3 = pnand %p1180_p0, %p1622_p1  ;;  %p1188_p2 = por %p1187_p12, %p1186_p9 }
 0x354   : > { %p1182_p7 = pneg %p1181_p3 }
 0x355   : > { %v626_v58 = vpop.xlane.xlu0 %625 }
 0x356   : > { %1089 = vrcp.f32 %v626_v58  ;;  %p1189_p13 = pnand %p1188_p2, %p1182_p7 }
 0x360   : > { %v1090_v59 = vpop.eup %1089 }
 0x361   : > { %v628_v60 = vmul.f32 %v1090_v59, %v1086_v43 }
 0x363   : > { %v629_v61 = vpack.c.bf16 %v628_v60, %v628_v60 }
 0x365   : > { %991 = vmatmul.mubr.msk.bf16.vlgmr.msra.gmra.mrb[8].mxu0 %vm617_vm3, %v629_v61 }
 0x366   : > { %1002 = vmatprep.mubr.msk.bf16.mxu0 %vm1257_vm0, %v1256_v0 }
 0x3c8   : > { %v737_v62 = vpop.xlane.xlu1 %736 }
 0x3c9   : > { %1091 = vrcp.f32 %v737_v62 }
 0x3cc   : > { %v743_v63 = vpop.permute.xlu1 %742 }
 0x3cd   : > { %v748_v1 = vsel %vm633_vm4, %v743_v63, 0 }
 0x3ce   : > { %1001 = vmatpush3.bf16.msra.mxu0 %v748_v1 }
 0x3d3   : > { %v1092_v2 = vpop.eup %1091 }
 0x3d4   : > { %v739_v3 = vmul.f32 %v1092_v2, %v1088_v56 }
 0x3d6   : > { %v740_v4 = vpack.c.bf16 %v739_v3, %v739_v3 }
 0x3d8   : > { %1003 = vmatmul.mubr.msk.bf16.vlgmr.msra.gmra.mrb[12].mxu0 %vm617_vm3, %v740_v4 }
 0x438   : > { %v671_v5 = vpop.f32.mrb[8].mxu0 }
 0x439   : > { %v992_v6 = vpop.f32.mrb[9].mxu0 }
 0x43a   : > { %v674_v7 = vpop.f32.mrb[10].mxu0 }
 0x43b   : > { %v993_v8 = vpop.f32.mrb[11].mxu0 }
 0x4ab   : > { %v784_v9 = vpop.f32.mrb[12].mxu0 }
 0x4ac   : > { %791 = vrot.lane.b32.xlu1 %v784_v9, %s1259_s17  ;;  %v1004_v0 = vpop.f32.mrb[13].mxu0 }
 0x4ad   : > { %v787_v10 = vpop.f32.mrb[14].mxu0 }
 0x4ae   : > { %v1005_v11 = vpop.f32.mrb[15].mxu0 }
 0x51e   : > { %v792_v12 = vpop.permute.xlu1 %791 }
 0x51f   : > { %v794_v13 = vsel %vm570_vm2, %v671_v5, %v792_v12 }
 0x520   : > { %795 = vst.msk [vmem:[%s360_s18] sm:$0xff] %vm389_vm1, %v794_v13 }
 0x521   : > { %1192 = shalt.err (!%p1189_p13)
}
 0x522   : > { %s1193_s21 = scalar_lea.hbm %s1554_s15, 128  ;;  %s1197_s16 = scalar_lea.hbm %s1608_s8, 256 }
 0x523   : > { %p1194_p6 = scmp.ne.s32.totalorder %s1554_s15, %s1193_s21  ;;  %p1198_p5 = scmp.lt.u32.totalorder %s1554_s15, %s1608_s8 }
 0x524   : > { %p1199_p11 = scmp.lt.u32.totalorder %s1197_s16, %s1193_s21  ;;  %p1201_p0 = scmp.lt.u32.totalorder %s1193_s21, %s1554_s15 }
 0x525   : > { %p1195_p10 = pnand %p1194_p6, %p1622_p1 }
 0x526   : > { %p1200_p8 = por %p1199_p11, %p1198_p5 }
 0x527   : > { %p1196_p4 = pneg %p1195_p10 }
 0x528   : > { %p1202_p3 = por %p1201_p0, %p1200_p8 }
 0x52a   : > { %p1203_p7 = pnand %p1202_p3, %p1196_p4 }
 0x52c   : > { %1206 = shalt.err (!%p1203_p7)
}
 0x52d   : > { %1016 = dma.vmem_to_hbm [thread:$0]  (%p1622_p1), %s1556_s25, 128, %s1554_s15, %s797_s24  }
 0x52e PF: > { %s822_s10 = sand.u32 1, %s1237_s27   ;;  %p1623_p9 = scmp.ne.s32.totalorder %s1613_s12, 0 }
 0x52f   : > { %p1624_p12 = scmp.ge.s32.totalorder %s1249_s30, 2  ;;  %s823_s11 = scalar_lea.sflag [#allocation4], %s822_s10 }
 0x531   : > { %p1030_p2 = pnand %p1624_p12, %p1623_p9 }
 0x533   : > { %1232 = dma.done.wait (!%p1030_p2), %s823_s11, 128  }
 0x534   : > { %1234 = vsyncadd (!%p1030_p2), %s823_s11, 4294967168  ;;  %p22_p13 = scmp.ge.s32.totalorder %s1416_s20, 4   ;;  %s1625_s27 = smov %s1241_s28 }
 0x535   : > { %s1626_s28 = smov %s1245_s29  ;;  %s1627_s29 = smov %s1432_s23 }
 0x536   : > { %s1628_s30 = smov %s1416_s20  ;;  %24 = sbr.rel (!%p22_p13) target bundleno = 6 (0x6), region = 108 }
 0x53d   :  { %828 = vsyncpa [#allocation3], 1 }
 0x53e   :  { %830 = vsyncpa [#allocation3 + $0x1], 1 }
 0x53f   :  { %831 = vsyncpa [#allocation6], 1 }
 0x540   :  { %832 = vsyncpa [#allocation4], 1 }
 0x541   :  { %834 = vsyncpa [#allocation4 + $0x1], 1 }

</bundles_post_ra>
